<compile_context>
chip_gen: v5e
topology: v5e:2x2
jax: 0.10.0
libtpu: 0.0.40
codegen_flags: <defaults>
</compile_context>

<pallas_src>
import functools

import jax
import jax.numpy as jnp
from jax.experimental import pallas as pl
from jax.experimental.pallas import tpu as pltpu


def _moving_avg_kernel(x_ref, o_ref, xpad_ref, *,
                       kernel_size: int, stride: int, pad: int,
                       l_in: int, l_out: int):
    """x_ref: (TB, L, TC) block, o_ref: (TB, L_out, TC) block,
    xpad_ref: VMEM scratch (TB, L_pad, TC) holding the replicate-padded tile."""
    tb, _, c = x_ref.shape

    # Build the replicate-padded tile in VMEM (no HBM traffic).
    xpad_ref[:, pl.ds(pad, l_in), :] = x_ref[...]
    if pad > 0:
        first = x_ref[:, 0:1, :]                       # (TB, 1, TC)
        last = x_ref[:, l_in - 1:l_in, :]              # (TB, 1, TC)
        xpad_ref[:, pl.ds(0, pad), :] = jnp.broadcast_to(first, (tb, pad, c))
        xpad_ref[:, pl.ds(pad + l_in, pad), :] = jnp.broadcast_to(last, (tb, pad, c))

    if stride == 1:
        # Direct per-tap vector loads from the scratch ref at static sublane
        # offsets; pairwise accumulation keeps the dependency chain short while
        # holding only ~3 live f32 tiles.
        def tap(j):
            return xpad_ref[:, pl.ds(j, l_out), :].astype(jnp.float32)

        acc = tap(0)
        j = 1
        while j + 1 < kernel_size:
            acc = acc + (tap(j) + tap(j + 1))
            j += 2
        if j < kernel_size:
            acc = acc + tap(j)
    else:
        # General stride (rare in practice): one load, static strided slices.
        xp = xpad_ref[...]

        def tap(j):
            end = j + (l_out - 1) * stride + 1
            return xp[:, j:end:stride, :].astype(jnp.float32)

        acc = tap(0)
        for j in range(1, kernel_size):
            acc = acc + tap(j)

    o_ref[...] = (acc * (1.0 / kernel_size)).astype(o_ref.dtype)


def _pick_tiles(B: int, L: int, L_pad: int, L_out: int, C: int,
                itemsize: int, vmem_budget: int = 8 * 1024 * 1024):
    """Pick (batch_tile, channel_tile) so the per-step footprint fits the VMEM
    budget while leaving >= 2 grid steps whenever the problem allows it."""

    def per_row(tc):
        # input + output blocks double-buffered, padded scratch, live f32 acc.
        return (2 * L * tc * itemsize + 2 * L_out * tc * itemsize
                + L_pad * tc * itemsize + 2 * L_out * tc * 4)

    tc = C
    if C % 128 == 0 and C >= 256 and (B == 1 or per_row(C) > vmem_budget):
        best = 128
        for d in range(128, C, 128):
            if C % d != 0 or per_row(d) > vmem_budget:
                continue
            if B == 1 and C // d < 2:
                continue
            best = max(best, d)
        tc = best

    tb_cap = max(1, vmem_budget // max(per_row(tc), 1))
    if B >= 2 and C // tc < 2:
        tb_cap = min(tb_cap, pl.cdiv(B, 2))   # keep >= 2 grid steps (megacore)
    tb = 1
    for d in range(1, B + 1):
        if B % d == 0 and d <= tb_cap:
            tb = d
    return tb, tc


def moving_avg(x: jax.Array, kernel_size: int, stride: int) -> jax.Array:
    """x: (B, L, C) -> (B, L_out, C), matching torch moving_avg.forward."""
    B, L, C = x.shape
    pad = (kernel_size - 1) // 2
    L_pad = L + 2 * pad
    L_out = (L_pad - kernel_size) // stride + 1

    tb, tc = _pick_tiles(B, L, L_pad, L_out, C, x.dtype.itemsize)

    kernel = functools.partial(
        _moving_avg_kernel, kernel_size=kernel_size, stride=stride,
        pad=pad, l_in=L, l_out=L_out)

    return pl.pallas_call(
        kernel,
        out_shape=jax.ShapeDtypeStruct((B, L_out, C), x.dtype),
        grid_spec=pltpu.PrefetchScalarGridSpec(
            num_scalar_prefetch=0,
            grid=(B // tb, C // tc),
            in_specs=[pl.BlockSpec((tb, L, tc), lambda b, cb: (b, 0, cb))],
            out_specs=pl.BlockSpec((tb, L_out, tc), lambda b, cb: (b, 0, cb)),
            scratch_shapes=[pltpu.VMEM((tb, L_pad, tc), x.dtype)],
        ),
        compiler_params=pltpu.CompilerParams(
            dimension_semantics=("parallel", "parallel"),
            vmem_limit_bytes=32 * 1024 * 1024),
    )(x)


def _moving_avg_ref(x: jax.Array, kernel_size: int, stride: int) -> jax.Array:
    """Plain-JAX reference matching the PyTorch module."""
    pad = (kernel_size - 1) // 2
    x_pad = jnp.concatenate(
        [jnp.repeat(x[:, 0:1, :], pad, axis=1), x,
         jnp.repeat(x[:, -1:, :], pad, axis=1)], axis=1)
    L_pad = x_pad.shape[1]
    L_out = (L_pad - kernel_size) // stride + 1
    return jnp.stack(
        [x_pad[:, t * stride:t * stride + kernel_size, :].mean(axis=1)
         for t in range(L_out)], axis=1)


if __name__ == "__main__":
    key = jax.random.PRNGKey(0)
    cases = [
        # DLinear-ish: odd kernel, stride 1 (per-tap fast path, small C)
        dict(B=2, L=32, C=8, kernel_size=25, stride=1),
        # even kernel (asymmetric pad) + stride > 1 (strided-slice path)
        dict(B=4, L=24, C=16, kernel_size=4, stride=2),
        # B == 1 with lane-multiple C: exercises the channel-tiling grid axis
        dict(B=1, L=32, C=256, kernel_size=25, stride=1),
    ]
    for cfg in cases:
        key, sub = jax.random.split(key)
        x = jax.random.normal(
            sub, (cfg["B"], cfg["L"], cfg["C"]), dtype=jnp.float32)
        out = jax.block_until_ready(
            moving_avg(x, cfg["kernel_size"], cfg["stride"]))
        ref = _moving_avg_ref(x, cfg["kernel_size"], cfg["stride"])
        assert out.shape == ref.shape, (out.shape, ref.shape)
        assert jnp.allclose(out, ref, atol=1e-5, rtol=1e-5), cfg
    print("KERNEL_OK")
</pallas_src>

<mosaic_0001>
module attributes {stable_mosaic.version = 11 : i64} {
  func.func @_moving_avg_kernel(%arg0: i32, %arg1: i32, %arg2: memref<1x32x8xf32, #tpu.memory_space<vmem>>, %arg3: memref<1x32x8xf32, #tpu.memory_space<vmem>>, %arg4: memref<1x56x8xf32, #tpu.memory_space<vmem>>) attributes {dimension_semantics = [#tpu.dimension_semantics<parallel>, #tpu.dimension_semantics<parallel>], iteration_bounds = array<i64: 2, 1>, scalar_prefetch = 0 : i64, scratch_operands = 1 : i64, tpu.core_type = #tpu.core_type<tc>, window_params = [{transform_indices = @transform_0, window_bounds = array<i64: 1, 32, 8>}, {transform_indices = @transform_1, window_bounds = array<i64: 1, 32, 8>}]} {
    %c0 = arith.constant 0 : index
    %c0_0 = arith.constant 0 : index
    %c0_1 = arith.constant 0 : index
    %0 = vector.load %arg2[%c0, %c0_0, %c0_1] : memref<1x32x8xf32, #tpu.memory_space<vmem>>, vector<1x32x8xf32>
    %c0_2 = arith.constant 0 : index
    %c12 = arith.constant 12 : index
    %c0_3 = arith.constant 0 : index
    %1 = vector.load %arg4[%c0_2, %c12, %c0_3] : memref<1x56x8xf32, #tpu.memory_space<vmem>>, vector<1x32x8xf32>
    tpu.vector_store %arg4[%c0_2, %c12, %c0_3], %0 {strides = array<i32>} : memref<1x56x8xf32, #tpu.memory_space<vmem>>, vector<1x32x8xf32>,
    %c0_4 = arith.constant 0 : index
    %c0_5 = arith.constant 0 : index
    %c0_6 = arith.constant 0 : index
    %2 = vector.load %arg2[%c0_4, %c0_5, %c0_6] : memref<1x32x8xf32, #tpu.memory_space<vmem>>, vector<1x1x8xf32>
    %c0_7 = arith.constant 0 : index
    %c31 = arith.constant 31 : index
    %c0_8 = arith.constant 0 : index
    %3 = vector.load %arg2[%c0_7, %c31, %c0_8] : memref<1x32x8xf32, #tpu.memory_space<vmem>>, vector<1x1x8xf32>
    %4 = vector.shape_cast %2 : vector<1x1x8xf32> to vector<1x1x8xf32>
    %5 = vector.broadcast %4 : vector<1x1x8xf32> to vector<1x12x8xf32>
    %c0_9 = arith.constant 0 : index
    %c0_10 = arith.constant 0 : index
    %c0_11 = arith.constant 0 : index
    %6 = vector.load %arg4[%c0_9, %c0_10, %c0_11] : memref<1x56x8xf32, #tpu.memory_space<vmem>>, vector<1x12x8xf32>
    tpu.vector_store %arg4[%c0_9, %c0_10, %c0_11], %5 {strides = array<i32>} : memref<1x56x8xf32, #tpu.memory_space<vmem>>, vector<1x12x8xf32>,
    %7 = vector.shape_cast %3 : vector<1x1x8xf32> to vector<1x1x8xf32>
    %8 = vector.broadcast %7 : vector<1x1x8xf32> to vector<1x12x8xf32>
    %c0_12 = arith.constant 0 : index
    %c44 = arith.constant 44 : index
    %c0_13 = arith.constant 0 : index
    %9 = vector.load %arg4[%c0_12, %c44, %c0_13] : memref<1x56x8xf32, #tpu.memory_space<vmem>>, vector<1x12x8xf32>
    tpu.vector_store %arg4[%c0_12, %c44, %c0_13], %8 {strides = array<i32>} : memref<1x56x8xf32, #tpu.memory_space<vmem>>, vector<1x12x8xf32>,
    %c0_14 = arith.constant 0 : index
    %c0_15 = arith.constant 0 : index
    %c0_16 = arith.constant 0 : index
    %10 = vector.load %arg4[%c0_14, %c0_15, %c0_16] : memref<1x56x8xf32, #tpu.memory_space<vmem>>, vector<1x32x8xf32>
    %c0_17 = arith.constant 0 : index
    %c1 = arith.constant 1 : index
    %c0_18 = arith.constant 0 : index
    %11 = vector.load %arg4[%c0_17, %c1, %c0_18] : memref<1x56x8xf32, #tpu.memory_space<vmem>>, vector<1x32x8xf32>
    %c0_19 = arith.constant 0 : index
    %c2 = arith.constant 2 : index
    %c0_20 = arith.constant 0 : index
    %12 = vector.load %arg4[%c0_19, %c2, %c0_20] : memref<1x56x8xf32, #tpu.memory_space<vmem>>, vector<1x32x8xf32>
    %13 = arith.addf %11, %12 : vector<1x32x8xf32>
    %14 = arith.addf %10, %13 : vector<1x32x8xf32>
    %c0_21 = arith.constant 0 : index
    %c3 = arith.constant 3 : index
    %c0_22 = arith.constant 0 : index
    %15 = vector.load %arg4[%c0_21, %c3, %c0_22] : memref<1x56x8xf32, #tpu.memory_space<vmem>>, vector<1x32x8xf32>
    %c0_23 = arith.constant 0 : index
    %c4 = arith.constant 4 : index
    %c0_24 = arith.constant 0 : index
    %16 = vector.load %arg4[%c0_23, %c4, %c0_24] : memref<1x56x8xf32, #tpu.memory_space<vmem>>, vector<1x32x8xf32>
    %17 = arith.addf %15, %16 : vector<1x32x8xf32>
    %18 = arith.addf %14, %17 : vector<1x32x8xf32>
    %c0_25 = arith.constant 0 : index
    %c5 = arith.constant 5 : index
    %c0_26 = arith.constant 0 : index
    %19 = vector.load %arg4[%c0_25, %c5, %c0_26] : memref<1x56x8xf32, #tpu.memory_space<vmem>>, vector<1x32x8xf32>
    %c0_27 = arith.constant 0 : index
    %c6 = arith.constant 6 : index
    %c0_28 = arith.constant 0 : index
    %20 = vector.load %arg4[%c0_27, %c6, %c0_28] : memref<1x56x8xf32, #tpu.memory_space<vmem>>, vector<1x32x8xf32>
    %21 = arith.addf %19, %20 : vector<1x32x8xf32>
    %22 = arith.addf %18, %21 : vector<1x32x8xf32>
    %c0_29 = arith.constant 0 : index
    %c7 = arith.constant 7 : index
    %c0_30 = arith.constant 0 : index
    %23 = vector.load %arg4[%c0_29, %c7, %c0_30] : memref<1x56x8xf32, #tpu.memory_space<vmem>>, vector<1x32x8xf32>
    %c0_31 = arith.constant 0 : index
    %c8 = arith.constant 8 : index
    %c0_32 = arith.constant 0 : index
    %24 = vector.load %arg4[%c0_31, %c8, %c0_32] : memref<1x56x8xf32, #tpu.memory_space<vmem>>, vector<1x32x8xf32>
    %25 = arith.addf %23, %24 : vector<1x32x8xf32>
    %26 = arith.addf %22, %25 : vector<1x32x8xf32>
    %c0_33 = arith.constant 0 : index
    %c9 = arith.constant 9 : index
    %c0_34 = arith.constant 0 : index
    %27 = vector.load %arg4[%c0_33, %c9, %c0_34] : memref<1x56x8xf32, #tpu.memory_space<vmem>>, vector<1x32x8xf32>
    %c0_35 = arith.constant 0 : index
    %c10 = arith.constant 10 : index
    %c0_36 = arith.constant 0 : index
    %28 = vector.load %arg4[%c0_35, %c10, %c0_36] : memref<1x56x8xf32, #tpu.memory_space<vmem>>, vector<1x32x8xf32>
    %29 = arith.addf %27, %28 : vector<1x32x8xf32>
    %30 = arith.addf %26, %29 : vector<1x32x8xf32>
    %c0_37 = arith.constant 0 : index
    %c11 = arith.constant 11 : index
    %c0_38 = arith.constant 0 : index
    %31 = vector.load %arg4[%c0_37, %c11, %c0_38] : memref<1x56x8xf32, #tpu.memory_space<vmem>>, vector<1x32x8xf32>
    %c0_39 = arith.constant 0 : index
    %c12_40 = arith.constant 12 : index
    %c0_41 = arith.constant 0 : index
    %32 = vector.load %arg4[%c0_39, %c12_40, %c0_41] : memref<1x56x8xf32, #tpu.memory_space<vmem>>, vector<1x32x8xf32>
    %33 = arith.addf %31, %32 : vector<1x32x8xf32>
    %34 = arith.addf %30, %33 : vector<1x32x8xf32>
    %c0_42 = arith.constant 0 : index
    %c13 = arith.constant 13 : index
    %c0_43 = arith.constant 0 : index
    %35 = vector.load %arg4[%c0_42, %c13, %c0_43] : memref<1x56x8xf32, #tpu.memory_space<vmem>>, vector<1x32x8xf32>
    %c0_44 = arith.constant 0 : index
    %c14 = arith.constant 14 : index
    %c0_45 = arith.constant 0 : index
    %36 = vector.load %arg4[%c0_44, %c14, %c0_45] : memref<1x56x8xf32, #tpu.memory_space<vmem>>, vector<1x32x8xf32>
    %37 = arith.addf %35, %36 : vector<1x32x8xf32>
    %38 = arith.addf %34, %37 : vector<1x32x8xf32>
    %c0_46 = arith.constant 0 : index
    %c15 = arith.constant 15 : index
    %c0_47 = arith.constant 0 : index
    %39 = vector.load %arg4[%c0_46, %c15, %c0_47] : memref<1x56x8xf32, #tpu.memory_space<vmem>>, vector<1x32x8xf32>
    %c0_48 = arith.constant 0 : index
    %c16 = arith.constant 16 : index
    %c0_49 = arith.constant 0 : index
    %40 = vector.load %arg4[%c0_48, %c16, %c0_49] : memref<1x56x8xf32, #tpu.memory_space<vmem>>, vector<1x32x8xf32>
    %41 = arith.addf %39, %40 : vector<1x32x8xf32>
    %42 = arith.addf %38, %41 : vector<1x32x8xf32>
    %c0_50 = arith.constant 0 : index
    %c17 = arith.constant 17 : index
    %c0_51 = arith.constant 0 : index
    %43 = vector.load %arg4[%c0_50, %c17, %c0_51] : memref<1x56x8xf32, #tpu.memory_space<vmem>>, vector<1x32x8xf32>
    %c0_52 = arith.constant 0 : index
    %c18 = arith.constant 18 : index
    %c0_53 = arith.constant 0 : index
    %44 = vector.load %arg4[%c0_52, %c18, %c0_53] : memref<1x56x8xf32, #tpu.memory_space<vmem>>, vector<1x32x8xf32>
    %45 = arith.addf %43, %44 : vector<1x32x8xf32>
    %46 = arith.addf %42, %45 : vector<1x32x8xf32>
    %c0_54 = arith.constant 0 : index
    %c19 = arith.constant 19 : index
    %c0_55 = arith.constant 0 : index
    %47 = vector.load %arg4[%c0_54, %c19, %c0_55] : memref<1x56x8xf32, #tpu.memory_space<vmem>>, vector<1x32x8xf32>
    %c0_56 = arith.constant 0 : index
    %c20 = arith.constant 20 : index
    %c0_57 = arith.constant 0 : index
    %48 = vector.load %arg4[%c0_56, %c20, %c0_57] : memref<1x56x8xf32, #tpu.memory_space<vmem>>, vector<1x32x8xf32>
    %49 = arith.addf %47, %48 : vector<1x32x8xf32>
    %50 = arith.addf %46, %49 : vector<1x32x8xf32>
    %c0_58 = arith.constant 0 : index
    %c21 = arith.constant 21 : index
    %c0_59 = arith.constant 0 : index
    %51 = vector.load %arg4[%c0_58, %c21, %c0_59] : memref<1x56x8xf32, #tpu.memory_space<vmem>>, vector<1x32x8xf32>
    %c0_60 = arith.constant 0 : index
    %c22 = arith.constant 22 : index
    %c0_61 = arith.constant 0 : index
    %52 = vector.load %arg4[%c0_60, %c22, %c0_61] : memref<1x56x8xf32, #tpu.memory_space<vmem>>, vector<1x32x8xf32>
    %53 = arith.addf %51, %52 : vector<1x32x8xf32>
    %54 = arith.addf %50, %53 : vector<1x32x8xf32>
    %c0_62 = arith.constant 0 : index
    %c23 = arith.constant 23 : index
    %c0_63 = arith.constant 0 : index
    %55 = vector.load %arg4[%c0_62, %c23, %c0_63] : memref<1x56x8xf32, #tpu.memory_space<vmem>>, vector<1x32x8xf32>
    %c0_64 = arith.constant 0 : index
    %c24 = arith.constant 24 : index
    %c0_65 = arith.constant 0 : index
    %56 = vector.load %arg4[%c0_64, %c24, %c0_65] : memref<1x56x8xf32, #tpu.memory_space<vmem>>, vector<1x32x8xf32>
    %57 = arith.addf %55, %56 : vector<1x32x8xf32>
    %58 = arith.addf %54, %57 : vector<1x32x8xf32>
    %cst = arith.constant 4.000000e-02 : f32
    %59 = vector.broadcast %cst : f32 to vector<1x32x8xf32>
    %60 = arith.mulf %58, %59 : vector<1x32x8xf32>
    %c0_66 = arith.constant 0 : index
    %c0_67 = arith.constant 0 : index
    %c0_68 = arith.constant 0 : index
    %61 = vector.load %arg3[%c0_66, %c0_67, %c0_68] : memref<1x32x8xf32, #tpu.memory_space<vmem>>, vector<1x32x8xf32>
    tpu.vector_store %arg3[%c0_66, %c0_67, %c0_68], %60 {strides = array<i32>} : memref<1x32x8xf32, #tpu.memory_space<vmem>>, vector<1x32x8xf32>,
    return
  }
  func.func @transform_0(%arg0: i32, %arg1: i32) -> (i32, i32, i32) {
    %c0_i32 = arith.constant 0 : i32
    %c0_i32_0 = arith.constant 0 : i32
    return %arg0, %c0_i32, %arg1 : i32, i32, i32
  }
  func.func @transform_1(%arg0: i32, %arg1: i32) -> (i32, i32, i32) {
    %c0_i32 = arith.constant 0 : i32
    %c0_i32_0 = arith.constant 0 : i32
    return %arg0, %c0_i32, %arg1 : i32, i32, i32
  }
}

</mosaic_0001>

<bundles_post_ra>
// kernel: tpu_custom_call.1
= control target key start
LH: loop header
LB: loop body
LE: loop exit
PB: predicated region body
PF: predicated region fallthrough
CT: control target
= control target key end

     0   :  { %s451_s6 = smov 0   ;;  %s453_s7 = smov 0   ;;  %s545_s0 = inlined_call_operand.vmem [shape: f32[2,32,8], index: 0, kind: input, shape index: {}]   ;;  %s546_s1 = inlined_call_operand.vmem [shape: f32[2,32,8], index: 1, kind: output, shape index: {}]  }
   0x1   :  { %s455_s8 = smov 0  }
   0x2 LB: > { %s23_s9 = sadd.s32 1, %s435_s7  ;;  %p382_p0 = scmp.ge.s32.totalorder %s439_s8, 1  ;;  %s439_s8 = sphi %s455_s8, %s11_s8   ;;  %s435_s7 = sphi %s453_s7, %s548_s7   ;;  %s431_s6 = sphi %s451_s6, %s547_s6  }
   0x3   : > { %p25_p1 = scmp.ge.s32.totalorder %s23_s9, 2  ;;  %p106_p2 = scmp.lt.s32.totalorder %s439_s8, 3 }
   0x5   : > { %s550_s9 = smov (%p25_p1, %s23_s9), 0  ;;  %p107_p3 = pnand %p382_p0, %p106_p2 }
   0x6   : > { %p132_p4 = scmp.lt.s32.totalorder (!%p107_p3), %s431_s6, 1 }
   0x7   : > { %110 = sbr.rel (%p107_p3) target bundleno = 68 (0x44), region = 24 }
   0xc   : > { %s552_s6 = smov (!%p132_p4, %s431_s6), 1  ;;  %vm152_vm0 = vcmask 64512   ;;  %vm161_vm1 = vcmask 60416  }
   0xd   : > { %s389_s10 = sshll.u32 %s552_s6, 5 }
   0xe   : > { %s139_s13 = scalar_lea.vmem %s545_s0, %s389_s10  ;;  %s147_s16 = scalar_lea.vmem %s546_s1, %s389_s10 }
   0xf   : > { %v148_v0 = vld [vmem:[%s139_s13] sm:$0xff]  ;;  %v149_v1 = vld [vmem:[%s139_s13 + $0x8] sm:$0xff]  ;;  %v150_v2 = vld [vmem:[%s139_s13 + $0x10] sm:$0xff] }
  0x10   : > { %153 = vst.msk [vmem:[#allocation2 + $0xc] sm:$0xff] %vm152_vm0, %v148_v0  ;;  %v151_v3 = vld [vmem:[%s139_s13 + $0x18] sm:$0xff]  ;;  %v415_v4 = vld [vmem:[%s139_s13] ss:$0 sm:$0xff] }
  0x11   : > { %154 = vst.msk [vmem:[#allocation2 + $0x14] sm:$0xff] %vm152_vm0, %v149_v1  ;;  %v416_v5 = vld [vmem:[%s139_s13 + $0x1f] ss:$0 sm:$0xff] }
  0x12   : > { %155 = vst.msk [vmem:[#allocation2 + $0x1c] sm:$0xff] %vm152_vm0, %v150_v2 }
  0x13   : > { %156 = vst.msk [vmem:[#allocation2 + $0x24] sm:$0xff] %vm152_vm0, %v151_v3 }
  0x14   : > { %160 = vst.msk [vmem:[#allocation2] sm:$0xff] %vm152_vm0, %v415_v4 }
  0x15   : > { %162 = vst.msk [vmem:[#allocation2 + $0x8] sm:$0xf] %vm161_vm1, %v415_v4 }
  0x16   : > { %164 = vst.msk [vmem:[#allocation2 + $0x2c] sm:$0xff] %vm152_vm0, %v416_v5 }
  0x17   : > { %165 = vst.msk [vmem:[#allocation2 + $0x34] sm:$0xf] %vm161_vm1, %v416_v5  ;;  %v191_v46 = vld [vmem:[#allocation2 + $0xc] sm:$0xff] }
  0x18   : > { %v172_v6 = vld [vmem:[#allocation2 + $0x11] sm:$0xff] }
  0x19   : > { %v176_v7 = vld [vmem:[#allocation2 + $0x12] sm:$0xff]  ;;  %v177_v11 = vld [vmem:[#allocation2 + $0x1a] sm:$0xff] }
  0x1a   : > { %v483_v8 = vld [vmem:[#allocation2 + $0x10] sm:$0xff]  ;;  %v169_v9 = vld [vmem:[#allocation2 + $0x18] sm:$0xff]  ;;  %v485_v12 = vadd.f32 %v176_v7, %v172_v6  ;;  %v222_v30 = vld [vmem:[#allocation2 + $0x20] sm:$0xff] }
  0x1b   : > { %v173_v10 = vld [vmem:[#allocation2 + $0x19] sm:$0xff]  ;;  %v231_v35 = vld [vmem:[#allocation2 + $0x21] sm:$0xff]  ;;  %v203_v5 = vld [vmem:[#allocation2 + $0xd] sm:$0xff] }
  0x1c   : > { %v487_v13 = vadd.f32 %v177_v11, %v173_v10  ;;  %v188_v14 = vld [vmem:[#allocation2 + $0x13] sm:$0xff]  ;;  %v189_v15 = vld [vmem:[#allocation2 + $0x1b] sm:$0xff]  ;;  %v184_v17 = vadd.f32 %v485_v12, %v483_v8  ;;  %v238_v40 = vld [vmem:[#allocation2 + $0x23] sm:$0xff] }
  0x1d   : > { %v192_v16 = vld [vmem:[#allocation2 + $0x14] sm:$0xff]  ;;  %v193_v18 = vld [vmem:[#allocation2 + $0x1c] sm:$0xff]  ;;  %v239_v41 = vld [vmem:[#allocation2 + $0x24] sm:$0xff] }
  0x1e   : > { %v491_v19 = vadd.f32 %v192_v16, %v188_v14  ;;  %v204_v20 = vld [vmem:[#allocation2 + $0x15] sm:$0xff]  ;;  %v205_v21 = vld [vmem:[#allocation2 + $0x1d] sm:$0xff]  ;;  %v185_v22 = vadd.f32 %v487_v13, %v169_v9  ;;  %v494_v23 = vadd.f32 %v193_v18, %v189_v15  ;;  %v245_v44 = vld [vmem:[#allocation2 + $0x25] sm:$0xff]  ;;  %v240_v52 = vadd.f32 %v239_v41, %v238_v40 }
  0x1f   : > { %v208_v24 = vld [vmem:[#allocation2 + $0x16] sm:$0xff]  ;;  %v209_v25 = vld [vmem:[#allocation2 + $0x1e] sm:$0xff]  ;;  %v246_v45 = vld [vmem:[#allocation2 + $0x26] sm:$0xff] }
  0x20   : > { %v220_v26 = vld [vmem:[#allocation2 + $0x17] sm:$0xff]  ;;  %v200_v27 = vadd.f32 %v491_v19, %v184_v17  ;;  %v497_v28 = vadd.f32 %v208_v24, %v204_v20  ;;  %v221_v29 = vld [vmem:[#allocation2 + $0x1f] sm:$0xff]  ;;  %v201_v31 = vadd.f32 %v494_v23, %v185_v22  ;;  %v500_v32 = vadd.f32 %v209_v25, %v205_v21  ;;  %v252_v48 = vld [vmem:[#allocation2 + $0x27] sm:$0xff] }
  0x21   : > { %v503_v34 = vadd.f32 %v220_v26, %v169_v9  ;;  %v232_v36 = vld [vmem:[#allocation2 + $0x22] sm:$0xff]  ;;  %v506_v38 = vadd.f32 %v222_v30, %v221_v29  ;;  %v175_v57 = vld [vmem:[#allocation2 + $0xa] sm:$0xff]  ;;  %v247_v2 = vadd.f32 %v246_v45, %v245_v44 }
  0x22   : > { %v216_v33 = vadd.f32 %v497_v28, %v200_v27  ;;  %v217_v37 = vadd.f32 %v500_v32, %v201_v31  ;;  %v233_v43 = vadd.f32 %v232_v36, %v231_v35  ;;  %v253_v49 = vld [vmem:[#allocation2 + $0x28] sm:$0xff]  ;;  %v166_v53 = vld [vmem:[#allocation2] sm:$0xff] }
  0x23   : > { %v170_v50 = vld [vmem:[#allocation2 + $0x1] sm:$0xff]  ;;  %v171_v55 = vld [vmem:[#allocation2 + $0x9] sm:$0xff]  ;;  %v254_v18 = vadd.f32 %v253_v49, %v252_v48 }
  0x24   : > { %v229_v39 = vadd.f32 %v503_v34, %v216_v33  ;;  %v230_v42 = vadd.f32 %v506_v38, %v217_v37  ;;  %v167_v54 = vld [vmem:[#allocation2 + $0x8] sm:$0xff]  ;;  %v179_v61 = vadd.f32 %v175_v57, %v171_v55 }
  0x25   : > { %v174_v56 = vld [vmem:[#allocation2 + $0x2] sm:$0xff]  ;;  %v187_v63 = vld [vmem:[#allocation2 + $0xb] sm:$0xff] }
  0x26   : > { %v236_v47 = vadd.f32 %v229_v39, %v487_v13  ;;  %v237_v51 = vadd.f32 %v233_v43, %v230_v42  ;;  %v259_v59 = vld [vmem:[#allocation2 + $0x29] sm:$0xff]  ;;  %v178_v60 = vadd.f32 %v174_v56, %v170_v50  ;;  %v183_v11 = vadd.f32 %v179_v61, %v167_v54 }
  0x27   : > { %v186_v62 = vld [vmem:[#allocation2 + $0x3] sm:$0xff]  ;;  %v195_v14 = vadd.f32 %v191_v46, %v187_v63  ;;  %v207_v15 = vld [vmem:[#allocation2 + $0xe] sm:$0xff] }
  0x28   : > { %v243_v58 = vadd.f32 %v236_v47, %v494_v23  ;;  %v190_v0 = vld [vmem:[#allocation2 + $0x4] sm:$0xff]  ;;  %v244_v1 = vadd.f32 %v240_v52, %v237_v51  ;;  %v182_v10 = vadd.f32 %v178_v60, %v166_v53  ;;  %v219_v21 = vld [vmem:[#allocation2 + $0xf] sm:$0xff]  ;;  %v211_v29 = vadd.f32 %v207_v15, %v203_v5 }
  0x29   : > { %v194_v3 = vadd.f32 %v190_v0, %v186_v62  ;;  %v202_v4 = vld [vmem:[#allocation2 + $0x5] sm:$0xff]  ;;  %v199_v27 = vadd.f32 %v195_v14, %v183_v11  ;;  %v273_v36 = vld [vmem:[#allocation2 + $0x2d] sm:$0xff]  ;;  %v224_v41 = vadd.f32 %v219_v21, %v483_v8 }
  0x2a   : > { %v206_v6 = vld [vmem:[#allocation2 + $0x6] sm:$0xff]  ;;  %v250_v7 = vadd.f32 %v243_v58, %v500_v32  ;;  %v251_v17 = vadd.f32 %v247_v2, %v244_v1  ;;  %v274_v37 = vld [vmem:[#allocation2 + $0x2e] sm:$0xff] }
  0x2b   : > { %v260_v9 = vld [vmem:[#allocation2 + $0x2a] sm:$0xff]  ;;  %v210_v20 = vadd.f32 %v206_v6, %v202_v4  ;;  %v198_v26 = vadd.f32 %v194_v3, %v182_v10  ;;  %v215_v40 = vadd.f32 %v211_v29, %v199_v27  ;;  %v275_v51 = vadd.f32 %v274_v37, %v273_v36 }
  0x2c   : > { %v218_v16 = vld [vmem:[#allocation2 + $0x7] sm:$0xff]  ;;  %v257_v22 = vadd.f32 %v250_v7, %v506_v38  ;;  %v258_v30 = vadd.f32 %v254_v18, %v251_v17  ;;  %v261_v31 = vadd.f32 %v260_v9, %v259_v59  ;;  %v280_v46 = vld [vmem:[#allocation2 + $0x2f] sm:$0xff] }
  0x2d   : > { %v266_v24 = vld [vmem:[#allocation2 + $0x2b] sm:$0xff]  ;;  %v223_v33 = vadd.f32 %v218_v16, %v167_v54  ;;  %v214_v39 = vadd.f32 %v210_v20, %v198_v26  ;;  %v228_v49 = vadd.f32 %v224_v41, %v215_v40 }
  0x2e   : > { %v267_v25 = vld [vmem:[#allocation2 + $0x2c] sm:$0xff]  ;;  %v264_v35 = vadd.f32 %v257_v22, %v233_v43  ;;  %v265_v42 = vadd.f32 %v261_v31, %v258_v30 }
  0x2f   : > { %v268_v44 = vadd.f32 %v267_v25, %v266_v24  ;;  %v281_v47 = vld [vmem:[#allocation2 + $0x30] sm:$0xff]  ;;  %v227_v48 = vadd.f32 %v223_v33, %v214_v39  ;;  %v235_v43 = vadd.f32 %v228_v49, %v485_v12 }
  0x30   : > { %v271_v45 = vadd.f32 %v264_v35, %v240_v52  ;;  %v282_v56 = vadd.f32 %v281_v47, %v280_v46 }
  0x31   : > { %v272_v50 = vadd.f32 %v268_v44, %v265_v42  ;;  %v234_v55 = vadd.f32 %v227_v48, %v179_v61  ;;  %v242_v8 = vadd.f32 %v235_v43, %v491_v19 }
  0x32   : > { %v278_v53 = vadd.f32 %v271_v45, %v247_v2 }
  0x33   : > { %v279_v54 = vadd.f32 %v275_v51, %v272_v50  ;;  %v241_v58 = vadd.f32 %v234_v55, %v195_v14  ;;  %v249_v62 = vadd.f32 %v242_v8, %v497_v28 }
  0x34   : > { %v285_v57 = vadd.f32 %v278_v53, %v254_v18 }
  0x35   : > { %v286_v52 = vadd.f32 %v282_v56, %v279_v54  ;;  %v248_v60 = vadd.f32 %v241_v58, %v211_v29  ;;  %v256_v0 = vadd.f32 %v249_v62, %v503_v34 }
  0x36   : > { %v289_v59 = vmul.f32 0.04, %v285_v57 }
  0x37   : > { %v290_v63 = vmul.f32 0.04, %v286_v52  ;;  %v255_v61 = vadd.f32 %v248_v60, %v224_v41  ;;  %v263_v2 = vadd.f32 %v256_v0, %v487_v13 }
  0x38   : > { %293 = vst.msk [vmem:[%s147_s16 + $0x10] sm:$0xff] %vm152_vm0, %v289_v59 }
  0x39   : > { %294 = vst.msk [vmem:[%s147_s16 + $0x18] sm:$0xff] %vm152_vm0, %v290_v63  ;;  %v262_v1 = vadd.f32 %v255_v61, %v485_v12  ;;  %v270_v4 = vadd.f32 %v263_v2, %v494_v23 }
  0x3b   : > { %v269_v3 = vadd.f32 %v262_v1, %v491_v19  ;;  %v277_v6 = vadd.f32 %v270_v4, %v500_v32 }
  0x3d   : > { %v276_v5 = vadd.f32 %v269_v3, %v497_v28  ;;  %v284_v9 = vadd.f32 %v277_v6, %v506_v38 }
  0x3f   : > { %v283_v7 = vadd.f32 %v276_v5, %v503_v34  ;;  %v288_v11 = vmul.f32 0.04, %v284_v9 }
  0x41   : > { %v287_v10 = vmul.f32 0.04, %v283_v7  ;;  %292 = vst.msk [vmem:[%s147_s16 + $0x8] sm:$0xff] %vm152_vm0, %v288_v11 }
  0x43   : > { %291 = vst.msk [vmem:[%s147_s16] sm:$0xff] %vm152_vm0, %v287_v10 }
  0x44 PF: > { %s11_s8 = sadd.s32 1, %s439_s8   ;;  %s547_s6 = smov %s435_s7 }
  0x45   : > { %p8_p5 = scmp.ge.s32.totalorder %s11_s8, 4   ;;  %s548_s7 = smov %s550_s9 }
  0x47   :  { %10 = sbr.rel (!%p8_p5) target bundleno = 2 (0x2), region = 54 }

</bundles_post_ra>
